<compile_context>
chip_gen: v7x
topology: tpu7x:2x2x1
jax: 0.10.0
libtpu: 0.0.40
codegen_flags: <defaults>
</compile_context>

<pallas_src>
import functools

import jax
import jax.numpy as jnp
from jax.experimental import pallas as pl
from jax.experimental.pallas import tpu as pltpu


def _round_up(x, m):
    return ((x + m - 1) // m) * m


def _vmem_ceiling_bytes():
    """~87% of per-core VMEM capacity (128 MiB v5e/v6e, 64 MiB v7x)."""
    try:
        cap = int(pltpu.get_tpu_info().vmem_capacity_bytes)
    except Exception:  # conservative fallback (v7x-sized)
        cap = 64 << 20
    return max(int(cap * 0.87), 32 << 20)


def _vmem_limit(request_bytes, ceiling):
    # 25% headroom over the accounted footprint, clamped to the HW ceiling.
    return int(min(max(request_bytes * 5 // 4, 16 << 20), ceiling))


def _pick_tile_m(n_pad, i_pad, adj_bytes, ceiling, res_buf):
    """Largest row tile (multiple of 128, divides n_pad) whose pass-2 VMEM
    footprint fits comfortably; bigger tiles on 128-MiB (v5e/v6e) parts."""
    cap_tile = 512 if ceiling >= (100 << 20) else 256  # v5e/v6e vs v7x

    def pass2_footprint(t):
        return (res_buf * n_pad * i_pad * 2   # resident bf16 e_all
                + 2 * t * i_pad * 2           # e row tile (double buffered)
                + 2 * t * n_pad * adj_bytes   # out tile (double buffered)
                + 3 * t * n_pad * 4)          # s / work / keep live f32 temps

    for cand in (512, 256, 128):
        if (cand <= cap_tile and n_pad % cand == 0
                and pass2_footprint(cand) <= int(ceiling * 0.8)):
            return cand
    return 128


def _embed_kernel(x_ref, w1_ref, b1_ref, w2_ref, b2_ref, e_ref, *,
                  tile_m, n_valid, mask_rows):
    """Row tile of: e = normalize(relu(x @ W1 + b1) @ W2 + b2, dim=1).

    Rows with global index >= n_valid are stored as exactly 0.0 so the
    O(N^2) similarity pass needs no padding mask at all."""
    # Layer 1 (MXU, bf16 operands, f32 accumulation) + bias + relu.
    h = jnp.dot(x_ref[...], w1_ref[...], preferred_element_type=jnp.float32)
    h = jnp.maximum(h + b1_ref[...], 0.0)
    # Layer 2 (no activation).
    e = jnp.dot(h.astype(w2_ref.dtype), w2_ref[...],
                preferred_element_type=jnp.float32)
    e = e + b2_ref[...]
    # F.normalize(dim=1, p=2): x / max(||x||, 1e-12) == x * rsqrt(max(||x||^2, 1e-24))
    sq = jnp.sum(e * e, axis=-1, keepdims=True)
    e = e * jax.lax.rsqrt(jnp.maximum(sq, jnp.float32(1e-24)))
    if mask_rows:
        # O(N*isize) row mask here replaces an O(N^2) column mask in pass 2.
        row = (jax.lax.broadcasted_iota(jnp.int32, e.shape, 0)
               + pl.program_id(0) * tile_m)
        e = jnp.where(row < n_valid, e, 0.0)
    e_ref[...] = e.astype(e_ref.dtype)


def _graph_kernel(e_row_ref, e_all_ref, out_ref, *, topk):
    """Row tile of: relu(top_k(e @ e^T, topk)).

    Padded rows/columns of e are exactly 0 (see _embed_kernel), so padded
    similarities are 0 and are dropped by the final `s > 0` select -- no
    per-tile padding mask needed."""
    # Contract the feature dim of both operands (e @ e^T without an explicit
    # e.T).  NOTE(review item): if a bundle dump ever shows a per-grid-step
    # vxpose of e_all here, materialize e^T once in pass 1 instead.
    s = jax.lax.dot_general(
        e_row_ref[...], e_all_ref[...],
        dimension_numbers=(((1,), (1,)), ((), ())),
        preferred_element_type=jnp.float32)

    neg = jnp.float32(-1e30)
    # top-(k+1): peel the row max `topk` times to get the per-row threshold.
    # Last peel only needs the threshold (no masking pass).  Boundary ties are
    # all kept (differs from torch.topk's exact-k only on exact ties).
    work = s
    thresh = None
    for it in range(topk):
        thresh = jnp.max(work, axis=-1, keepdims=True)
        if it + 1 < topk:
            work = jnp.where(work >= thresh, neg, work)

    # Fused top-k mask + ReLU: one compare + one select pass.
    keep = jnp.logical_and(s >= thresh, s > 0.0)
    out_ref[...] = jnp.where(keep, s, 0.0).astype(out_ref.dtype)


def _resident(block_shape, index_map, single_buffered):
    """Spec for an operand whose block index is constant across the grid.
    Buffered(1) halves its VMEM allocation (no re-DMA is needed anyway)."""
    if single_buffered:
        return pl.BlockSpec(block_shape, index_map,
                            pipeline_mode=pl.Buffered(1))
    return pl.BlockSpec(block_shape, index_map)


def _forward_impl(features, w1, b1, w2, b2, k, *, tile_m, mxu_dtype,
                  adj_dtype, trim_output, single_buffer_resident):
    n, isize = features.shape
    n_pad = _round_up(max(n, 1), 128)
    i_pad = _round_up(max(isize, 1), 128)
    topk = min(int(k) + 1, n)  # guard against k + 1 > N

    mxu_bytes = jnp.dtype(mxu_dtype).itemsize
    adj_bytes = jnp.dtype(adj_dtype).itemsize
    res_buf = 1 if single_buffer_resident else 2
    ceiling = _vmem_ceiling_bytes()
    if tile_m is None:
        tile_m = _pick_tile_m(n_pad, i_pad, adj_bytes, ceiling, res_buf)
    tile_m = min(tile_m, n_pad)

    # Host-side zero-padding to lane-dense (multiple-of-128) shapes; MXU
    # operands cast to bf16 (f32 accumulation inside the kernels).
    xp = jnp.zeros((n_pad, i_pad), mxu_dtype).at[:n, :isize].set(
        features.astype(mxu_dtype))
    w1p = jnp.zeros((i_pad, i_pad), mxu_dtype).at[:isize, :isize].set(
        w1.astype(mxu_dtype))
    w2p = jnp.zeros((i_pad, i_pad), mxu_dtype).at[:isize, :isize].set(
        w2.astype(mxu_dtype))
    b1p = jnp.zeros((1, i_pad), jnp.float32).at[:, :isize].set(
        b1.astype(jnp.float32))
    b2p = jnp.zeros((1, i_pad), jnp.float32).at[:, :isize].set(
        b2.astype(jnp.float32))

    # ---- Pass 1: normalized embeddings (bf16 out), row-tiled --------------
    grid1 = (n_pad // tile_m,)
    embed_kernel = functools.partial(
        _embed_kernel, tile_m=tile_m, n_valid=n, mask_rows=(n != n_pad))
    vmem1 = _vmem_limit(
        2 * tile_m * i_pad * mxu_bytes              # x tile (double buffered)
        + res_buf * 2 * i_pad * i_pad * mxu_bytes   # W1 + W2 (resident)
        + res_buf * 2 * i_pad * 4                   # b1 + b2 (resident)
        + 2 * tile_m * i_pad * mxu_bytes            # e out tile (double buf.)
        + 3 * tile_m * i_pad * 4,                   # h / e f32 temporaries
        ceiling)
    e = pl.pallas_call(
        embed_kernel,
        out_shape=jax.ShapeDtypeStruct((n_pad, i_pad), mxu_dtype),
        grid_spec=pltpu.PrefetchScalarGridSpec(
            num_scalar_prefetch=0,
            grid=grid1,
            in_specs=[
                pl.BlockSpec((tile_m, i_pad), lambda i: (i, 0)),   # x row tile
                _resident((i_pad, i_pad), lambda i: (0, 0),
                          single_buffer_resident),                 # W1
                _resident((1, i_pad), lambda i: (0, 0),
                          single_buffer_resident),                 # b1
                _resident((i_pad, i_pad), lambda i: (0, 0),
                          single_buffer_resident),                 # W2
                _resident((1, i_pad), lambda i: (0, 0),
                          single_buffer_resident),                 # b2
            ],
            out_specs=pl.BlockSpec((tile_m, i_pad), lambda i: (i, 0)),
        ),
        compiler_params=pltpu.CompilerParams(
            dimension_semantics=("parallel",),
            vmem_limit_bytes=vmem1),
    )(xp, w1p, b1p, w2p, b2p)

    # ---- Pass 2: similarity + top-k mask + relu, row-tiled over (N, N) ----
    # Only valid row tiles are computed when the caller wants the trimmed
    # (n, n) result; padded rows are all-zero anyway (zero e rows).
    n_row_tiles = pl.cdiv(n, tile_m) if trim_output else n_pad // tile_m
    m_rows = n_row_tiles * tile_m
    graph_kernel = functools.partial(_graph_kernel, topk=topk)
    vmem2 = _vmem_limit(
        res_buf * n_pad * i_pad * mxu_bytes     # resident e_all
        + 2 * tile_m * i_pad * mxu_bytes        # e row tile (double buffered)
        + 2 * tile_m * n_pad * adj_bytes        # out tile (double buffered)
        + 3 * tile_m * n_pad * 4,               # s / work / keep temporaries
        ceiling)
    # TODO(synk): for N*isize too large for a resident e_all in VMEM (v7x has
    # only 64 MiB/TC), pass 2 should become a 2-D (row tile x column block)
    # grid with a streaming top-(k+1) carried in VMEM scratch.
    adj = pl.pallas_call(
        graph_kernel,
        out_shape=jax.ShapeDtypeStruct((m_rows, n_pad), adj_dtype),
        grid_spec=pltpu.PrefetchScalarGridSpec(
            num_scalar_prefetch=0,
            grid=(n_row_tiles,),
            in_specs=[
                pl.BlockSpec((tile_m, i_pad), lambda i: (i, 0)),   # e row tile
                _resident((n_pad, i_pad), lambda i: (0, 0),
                          single_buffer_resident),                 # full e
            ],
            out_specs=pl.BlockSpec((tile_m, n_pad), lambda i: (i, 0)),
        ),
        compiler_params=pltpu.CompilerParams(
            dimension_semantics=("parallel",),
            vmem_limit_bytes=vmem2),
    )(e, e)

    if not trim_output:
        return adj                      # zero-padded (n_pad, n_pad), no copy
    if m_rows == n and n_pad == n:
        return adj
    return adj[:n, :n]


def mlp_learner_forward(features, w1, b1, w2, b2, k, *, tile_m=None,
                        mxu_dtype=jnp.bfloat16, adj_dtype=jnp.float32,
                        trim_output=True):
    """Dense (sparse=False) forward of MLP_learner.

    features: (N, isize) float32.
    w1, w2:   (isize, isize), stored as (in, out) == W^T.
    b1, b2:   (1, isize).
    Returns (N, N) adjacency (or zero-padded (N_pad, N_pad) if
    trim_output=False).  adj_dtype=jnp.bfloat16 halves the N^2 writeback on
    HBM-write-bound parts (v5e) if downstream tolerates it.
    """
    try:
        return _forward_impl(features, w1, b1, w2, b2, k, tile_m=tile_m,
                             mxu_dtype=mxu_dtype, adj_dtype=adj_dtype,
                             trim_output=trim_output,
                             single_buffer_resident=True)
    except Exception:
        # pipeline_mode=pl.Buffered(1) not supported by this JAX/Mosaic build:
        # fall back to default double-buffered resident operands.
        return _forward_impl(features, w1, b1, w2, b2, k, tile_m=tile_m,
                             mxu_dtype=mxu_dtype, adj_dtype=adj_dtype,
                             trim_output=trim_output,
                             single_buffer_resident=False)


def init_params(key, isize, nlayers=2):
    """Deterministic parameter init mimicking the module's __init__:
    xavier_normal_(weight, gain=1.414); biases use the default Linear init."""
    assert nlayers == 2  # the common 2-layer case
    gain = 1.414
    std = gain * (2.0 / (isize + isize)) ** 0.5
    bound = 1.0 / (isize ** 0.5)
    k1, k2, k3, k4 = jax.random.split(key, 4)
    # Stored as (in, out) == W^T so the kernel computes x @ W^T directly.
    w1 = jax.random.normal(k1, (isize, isize), jnp.float32) * std
    w2 = jax.random.normal(k2, (isize, isize), jnp.float32) * std
    b1 = jax.random.uniform(k3, (1, isize), jnp.float32, -bound, bound)
    b2 = jax.random.uniform(k4, (1, isize), jnp.float32, -bound, bound)
    return w1, b1, w2, b2


if __name__ == "__main__":
    N = 16       # number of nodes
    ISIZE = 32   # feature / hidden size
    K = 5        # self.k  (top_k uses k + 1 = 6)

    key = jax.random.PRNGKey(0)
    kx, kp = jax.random.split(key)
    features = jax.random.normal(kx, (N, ISIZE), jnp.float32)
    w1, b1, w2, b2 = init_params(kp, ISIZE, nlayers=2)

    out = mlp_learner_forward(features, w1, b1, w2, b2, K)
    out = jax.block_until_ready(out)

    assert out.shape == (N, N) and out.dtype == jnp.float32
    # Each row keeps the top k+1 entries before relu; relu zeroes negatives,
    # so nonzeros per row <= K+1 (exact ties are measure-zero for random
    # continuous inputs).
    nnz_per_row = (out != 0.0).sum(axis=-1)
    assert bool((nnz_per_row <= K + 1).all())
    assert bool(jnp.isfinite(out).all())

    print("KERNEL_OK")
</pallas_src>

<mosaic_0001>
module attributes {stable_mosaic.version = 11 : i64} {
  func.func @_embed_kernel(%arg0: i32, %arg1: memref<128x128xbf16, #tpu.memory_space<vmem>>, %arg2: memref<128x128xbf16, #tpu.memory_space<vmem>>, %arg3: memref<1x128xf32, #tpu.memory_space<vmem>>, %arg4: memref<128x128xbf16, #tpu.memory_space<vmem>>, %arg5: memref<1x128xf32, #tpu.memory_space<vmem>>, %arg6: memref<128x128xbf16, #tpu.memory_space<vmem>>) attributes {dimension_semantics = [#tpu.dimension_semantics<parallel>], iteration_bounds = array<i64: 1>, scalar_prefetch = 0 : i64, scratch_operands = 0 : i64, tpu.core_type = #tpu.core_type<tc>, window_params = [{transform_indices = @transform_0, window_bounds = array<i64: 128, 128>}, {pipeline_mode = #tpu.pipeline_mode<synchronous>, transform_indices = @transform_1, window_bounds = array<i64: 128, 128>}, {pipeline_mode = #tpu.pipeline_mode<synchronous>, transform_indices = @transform_2, window_bounds = array<i64: 1, 128>}, {pipeline_mode = #tpu.pipeline_mode<synchronous>, transform_indices = @transform_3, window_bounds = array<i64: 128, 128>}, {pipeline_mode = #tpu.pipeline_mode<synchronous>, transform_indices = @transform_4, window_bounds = array<i64: 1, 128>}, {transform_indices = @transform_5, window_bounds = array<i64: 128, 128>}]} {
    %c0 = arith.constant 0 : index
    %c0_0 = arith.constant 0 : index
    %0 = vector.load %arg1[%c0, %c0_0] : memref<128x128xbf16, #tpu.memory_space<vmem>>, vector<128x128xbf16>
    %c0_1 = arith.constant 0 : index
    %c0_2 = arith.constant 0 : index
    %1 = vector.load %arg2[%c0_1, %c0_2] : memref<128x128xbf16, #tpu.memory_space<vmem>>, vector<128x128xbf16>
    %cst = arith.constant dense<0.000000e+00> : vector<128x128xf32>
    %2 = tpu.matmul %0, %1, %cst {dimension_numbers = #tpu.dot_dimension_numbers<[1], [0], [0], [1], [0, 0, 1, 1], [], []>} : vector<128x128xbf16>, vector<128x128xbf16>, vector<128x128xf32> -> vector<128x128xf32>
    %c0_3 = arith.constant 0 : index
    %c0_4 = arith.constant 0 : index
    %3 = vector.load %arg3[%c0_3, %c0_4] : memref<1x128xf32, #tpu.memory_space<vmem>>, vector<1x128xf32>
    %4 = vector.broadcast %3 : vector<1x128xf32> to vector<128x128xf32>
    %5 = arith.addf %2, %4 : vector<128x128xf32>
    %cst_5 = arith.constant 0.000000e+00 : f32
    %6 = vector.broadcast %cst_5 : f32 to vector<128x128xf32>
    %7 = arith.maximumf %5, %6 : vector<128x128xf32>
    %8 = arith.truncf %7 : vector<128x128xf32> to vector<128x128xbf16>
    %c0_6 = arith.constant 0 : index
    %c0_7 = arith.constant 0 : index
    %9 = vector.load %arg4[%c0_6, %c0_7] : memref<128x128xbf16, #tpu.memory_space<vmem>>, vector<128x128xbf16>
    %cst_8 = arith.constant dense<0.000000e+00> : vector<128x128xf32>
    %10 = tpu.matmul %8, %9, %cst_8 {dimension_numbers = #tpu.dot_dimension_numbers<[1], [0], [0], [1], [0, 0, 1, 1], [], []>} : vector<128x128xbf16>, vector<128x128xbf16>, vector<128x128xf32> -> vector<128x128xf32>
    %c0_9 = arith.constant 0 : index
    %c0_10 = arith.constant 0 : index
    %11 = vector.load %arg5[%c0_9, %c0_10] : memref<1x128xf32, #tpu.memory_space<vmem>>, vector<1x128xf32>
    %12 = vector.broadcast %11 : vector<1x128xf32> to vector<128x128xf32>
    %13 = arith.addf %10, %12 : vector<128x128xf32>
    %14 = arith.mulf %13, %13 : vector<128x128xf32>
    %cst_11 = arith.constant dense<0.000000e+00> : vector<128xf32>
    %15 = vector.multi_reduction <add>, %14, %cst_11 [1] : vector<128x128xf32> to vector<128xf32>
    %16 = vector.shape_cast %15 : vector<128xf32> to vector<128x1xf32>
    %cst_12 = arith.constant 1.000000e-24 : f32
    %17 = vector.broadcast %cst_12 : f32 to vector<128x1xf32>
    %18 = arith.maximumf %16, %17 : vector<128x1xf32>
    %19 = math.rsqrt %18 : vector<128x1xf32>
    %20 = vector.broadcast %19 : vector<128x1xf32> to vector<128x128xf32>
    %21 = arith.mulf %13, %20 : vector<128x128xf32>
    %22 = tpu.iota {dimensions = array<i32: 0>} : vector<128x128xi32>
    %c128_i32 = arith.constant 128 : i32
    %23 = arith.muli %arg0, %c128_i32 : i32
    %24 = vector.broadcast %23 : i32 to vector<128x128xi32>
    %25 = arith.addi %22, %24 : vector<128x128xi32>
    %c16_i32 = arith.constant 16 : i32
    %26 = vector.broadcast %c16_i32 : i32 to vector<128x128xi32>
    %27 = arith.cmpi slt, %25, %26 : vector<128x128xi32>
    %cst_13 = arith.constant 0.000000e+00 : f32
    %28 = vector.broadcast %cst_13 : f32 to vector<128x128xf32>
    %29 = arith.select %27, %21, %28 : vector<128x128xi1>, vector<128x128xf32>
    %30 = arith.truncf %29 : vector<128x128xf32> to vector<128x128xbf16>
    %c0_14 = arith.constant 0 : index
    %c0_15 = arith.constant 0 : index
    %31 = vector.load %arg6[%c0_14, %c0_15] : memref<128x128xbf16, #tpu.memory_space<vmem>>, vector<128x128xbf16>
    tpu.vector_store %arg6[%c0_14, %c0_15], %30 {strides = array<i32>} : memref<128x128xbf16, #tpu.memory_space<vmem>>, vector<128x128xbf16>,
    return
  }
  func.func @transform_0(%arg0: i32) -> (i32, i32) {
    %c0_i32 = arith.constant 0 : i32
    %c0_i32_0 = arith.constant 0 : i32
    return %arg0, %c0_i32 : i32, i32
  }
  func.func @transform_1(%arg0: i32) -> (i32, i32) {
    %c0_i32 = arith.constant 0 : i32
    %c0_i32_0 = arith.constant 0 : i32
    %c0_i32_1 = arith.constant 0 : i32
    return %c0_i32, %c0_i32_0 : i32, i32
  }
  func.func @transform_2(%arg0: i32) -> (i32, i32) {
    %c0_i32 = arith.constant 0 : i32
    %c0_i32_0 = arith.constant 0 : i32
    %c0_i32_1 = arith.constant 0 : i32
    return %c0_i32, %c0_i32_0 : i32, i32
  }
  func.func @transform_3(%arg0: i32) -> (i32, i32) {
    %c0_i32 = arith.constant 0 : i32
    %c0_i32_0 = arith.constant 0 : i32
    %c0_i32_1 = arith.constant 0 : i32
    return %c0_i32, %c0_i32_0 : i32, i32
  }
  func.func @transform_4(%arg0: i32) -> (i32, i32) {
    %c0_i32 = arith.constant 0 : i32
    %c0_i32_0 = arith.constant 0 : i32
    %c0_i32_1 = arith.constant 0 : i32
    return %c0_i32, %c0_i32_0 : i32, i32
  }
  func.func @transform_5(%arg0: i32) -> (i32, i32) {
    %c0_i32 = arith.constant 0 : i32
    %c0_i32_0 = arith.constant 0 : i32
    return %arg0, %c0_i32 : i32, i32
  }
}

module attributes {stable_mosaic.version = 11 : i64} {
  func.func @_embed_kernel(%arg0: i32, %arg1: memref<128x128xbf16, #tpu.memory_space<vmem>>, %arg2: memref<128x128xbf16, #tpu.memory_space<vmem>>, %arg3: memref<1x128xf32, #tpu.memory_space<vmem>>, %arg4: memref<128x128xbf16, #tpu.memory_space<vmem>>, %arg5: memref<1x128xf32, #tpu.memory_space<vmem>>, %arg6: memref<128x128xbf16, #tpu.memory_space<vmem>>) attributes {dimension_semantics = [#tpu.dimension_semantics<parallel>], iteration_bounds = array<i64: 1>, scalar_prefetch = 0 : i64, scratch_operands = 0 : i64, tpu.core_type = #tpu.core_type<tc>, window_params = [{transform_indices = @transform_0, window_bounds = array<i64: 128, 128>}, {pipeline_mode = #tpu.pipeline_mode<synchronous>, transform_indices = @transform_1, window_bounds = array<i64: 128, 128>}, {pipeline_mode = #tpu.pipeline_mode<synchronous>, transform_indices = @transform_2, window_bounds = array<i64: 1, 128>}, {pipeline_mode = #tpu.pipeline_mode<synchronous>, transform_indices = @transform_3, window_bounds = array<i64: 128, 128>}, {pipeline_mode = #tpu.pipeline_mode<synchronous>, transform_indices = @transform_4, window_bounds = array<i64: 1, 128>}, {transform_indices = @transform_5, window_bounds = array<i64: 128, 128>}]} {
    %c0 = arith.constant 0 : index
    %c0_0 = arith.constant 0 : index
    %0 = vector.load %arg1[%c0, %c0_0] : memref<128x128xbf16, #tpu.memory_space<vmem>>, vector<128x128xbf16>
    %c0_1 = arith.constant 0 : index
    %c0_2 = arith.constant 0 : index
    %1 = vector.load %arg2[%c0_1, %c0_2] : memref<128x128xbf16, #tpu.memory_space<vmem>>, vector<128x128xbf16>
    %cst = arith.constant dense<0.000000e+00> : vector<128x128xf32>
    %2 = tpu.matmul %0, %1, %cst {dimension_numbers = #tpu.dot_dimension_numbers<[1], [0], [0], [1], [0, 0, 1, 1], [], []>} : vector<128x128xbf16>, vector<128x128xbf16>, vector<128x128xf32> -> vector<128x128xf32>
    %c0_3 = arith.constant 0 : index
    %c0_4 = arith.constant 0 : index
    %3 = vector.load %arg3[%c0_3, %c0_4] : memref<1x128xf32, #tpu.memory_space<vmem>>, vector<1x128xf32>
    %4 = vector.broadcast %3 : vector<1x128xf32> to vector<128x128xf32>
    %5 = arith.addf %2, %4 : vector<128x128xf32>
    %cst_5 = arith.constant 0.000000e+00 : f32
    %6 = vector.broadcast %cst_5 : f32 to vector<128x128xf32>
    %7 = arith.maximumf %5, %6 : vector<128x128xf32>
    %8 = arith.truncf %7 : vector<128x128xf32> to vector<128x128xbf16>
    %c0_6 = arith.constant 0 : index
    %c0_7 = arith.constant 0 : index
    %9 = vector.load %arg4[%c0_6, %c0_7] : memref<128x128xbf16, #tpu.memory_space<vmem>>, vector<128x128xbf16>
    %cst_8 = arith.constant dense<0.000000e+00> : vector<128x128xf32>
    %10 = tpu.matmul %8, %9, %cst_8 {dimension_numbers = #tpu.dot_dimension_numbers<[1], [0], [0], [1], [0, 0, 1, 1], [], []>} : vector<128x128xbf16>, vector<128x128xbf16>, vector<128x128xf32> -> vector<128x128xf32>
    %c0_9 = arith.constant 0 : index
    %c0_10 = arith.constant 0 : index
    %11 = vector.load %arg5[%c0_9, %c0_10] : memref<1x128xf32, #tpu.memory_space<vmem>>, vector<1x128xf32>
    %12 = vector.broadcast %11 : vector<1x128xf32> to vector<128x128xf32>
    %13 = arith.addf %10, %12 : vector<128x128xf32>
    %14 = arith.mulf %13, %13 : vector<128x128xf32>
    %cst_11 = arith.constant dense<0.000000e+00> : vector<128xf32>
    %15 = vector.multi_reduction <add>, %14, %cst_11 [1] : vector<128x128xf32> to vector<128xf32>
    %16 = vector.shape_cast %15 : vector<128xf32> to vector<128x1xf32>
    %cst_12 = arith.constant 1.000000e-24 : f32
    %17 = vector.broadcast %cst_12 : f32 to vector<128x1xf32>
    %18 = arith.maximumf %16, %17 : vector<128x1xf32>
    %19 = math.rsqrt %18 : vector<128x1xf32>
    %20 = vector.broadcast %19 : vector<128x1xf32> to vector<128x128xf32>
    %21 = arith.mulf %13, %20 : vector<128x128xf32>
    %22 = tpu.iota {dimensions = array<i32: 0>} : vector<128x128xi32>
    %c128_i32 = arith.constant 128 : i32
    %23 = arith.muli %arg0, %c128_i32 : i32
    %24 = vector.broadcast %23 : i32 to vector<128x128xi32>
    %25 = arith.addi %22, %24 : vector<128x128xi32>
    %c16_i32 = arith.constant 16 : i32
    %26 = vector.broadcast %c16_i32 : i32 to vector<128x128xi32>
    %27 = arith.cmpi slt, %25, %26 : vector<128x128xi32>
    %cst_13 = arith.constant 0.000000e+00 : f32
    %28 = vector.broadcast %cst_13 : f32 to vector<128x128xf32>
    %29 = arith.select %27, %21, %28 : vector<128x128xi1>, vector<128x128xf32>
    %30 = arith.truncf %29 : vector<128x128xf32> to vector<128x128xbf16>
    %c0_14 = arith.constant 0 : index
    %c0_15 = arith.constant 0 : index
    %31 = vector.load %arg6[%c0_14, %c0_15] : memref<128x128xbf16, #tpu.memory_space<vmem>>, vector<128x128xbf16>
    tpu.vector_store %arg6[%c0_14, %c0_15], %30 {strides = array<i32>} : memref<128x128xbf16, #tpu.memory_space<vmem>>, vector<128x128xbf16>,
    return
  }
  func.func @transform_0(%arg0: i32) -> (i32, i32) {
    %c0_i32 = arith.constant 0 : i32
    %c0_i32_0 = arith.constant 0 : i32
    return %arg0, %c0_i32 : i32, i32
  }
  func.func @transform_1(%arg0: i32) -> (i32, i32) {
    %c0_i32 = arith.constant 0 : i32
    %c0_i32_0 = arith.constant 0 : i32
    %c0_i32_1 = arith.constant 0 : i32
    return %c0_i32, %c0_i32_0 : i32, i32
  }
  func.func @transform_2(%arg0: i32) -> (i32, i32) {
    %c0_i32 = arith.constant 0 : i32
    %c0_i32_0 = arith.constant 0 : i32
    %c0_i32_1 = arith.constant 0 : i32
    return %c0_i32, %c0_i32_0 : i32, i32
  }
  func.func @transform_3(%arg0: i32) -> (i32, i32) {
    %c0_i32 = arith.constant 0 : i32
    %c0_i32_0 = arith.constant 0 : i32
    %c0_i32_1 = arith.constant 0 : i32
    return %c0_i32, %c0_i32_0 : i32, i32
  }
  func.func @transform_4(%arg0: i32) -> (i32, i32) {
    %c0_i32 = arith.constant 0 : i32
    %c0_i32_0 = arith.constant 0 : i32
    %c0_i32_1 = arith.constant 0 : i32
    return %c0_i32, %c0_i32_0 : i32, i32
  }
  func.func @transform_5(%arg0: i32) -> (i32, i32) {
    %c0_i32 = arith.constant 0 : i32
    %c0_i32_0 = arith.constant 0 : i32
    return %arg0, %c0_i32 : i32, i32
  }
}

</mosaic_0001>

<bundles_post_ra>
// kernel: tpu_custom_call.1
= control target key start
LH: loop header
LB: loop body
LE: loop exit
PB: predicated region body
PF: predicated region fallthrough
CT: control target
= control target key end

     0   :  { %10 = vsyncpa [#allocation3], 0  ;;  %s1132_s0 = inlined_call_operand.hbm [shape: bf16[128,128], index: 0, kind: input, shape index: {}]   ;;  %s1133_s1 = inlined_call_operand.hbm [shape: bf16[128,128], index: 1, kind: input, shape index: {}]   ;;  %s1134_s2 = inlined_call_operand.vmem [shape: f32[1,128], index: 2, kind: input, shape index: {}]   ;;  %s1135_s3 = inlined_call_operand.hbm [shape: bf16[128,128], index: 3, kind: input, shape index: {}]   ;;  %s1136_s4 = inlined_call_operand.vmem [shape: f32[1,128], index: 4, kind: input, shape index: {}]   ;;  %s1137_s5 = inlined_call_operand.hbm [shape: bf16[128,128], index: 5, kind: output, shape index: {}]  }
   0x1   :  { %11 = vsyncpa [#allocation6], 0 }
   0x2   :  { %12 = vsyncpa [#allocation4], 0  ;;  %s1022_s18 = smov [#allocation5]   ;;  %s1023_s20 = smov [#allocation2]  }
   0x3   :  { %s30_s19 = sshll.u32 %s1022_s18, 4  ;;  %s18_s21 = sshll.u32 %s1023_s20, 4  ;;  %s31_s19 = int_to_ptr.vmem [resolvable:$true] %s30_s19  ;;  %s1059_s21 = int_to_ptr.vmem [resolvable:$true] %s18_s21 }
   0x4   :  { %s928_s24 = scalar_lea.hbm %s1133_s1, 1024 }
   0x5   :  { %p929_p0 = scmp.ne.s32.totalorder %s1133_s1, %s928_s24  ;;  %p932_p1 = scmp.lt.u32.totalorder %s928_s24, %s1133_s1 }
   0x7   :  { %p934_p2 = pnand %p932_p1, %p929_p0 }
   0x9   :  { %937 = shalt.err (!%p934_p2)
}
   0xa   :  { %s938_s29 = scalar_lea.vmem %s31_s19, 1024  ;;  %p943_p4 = scmp.lt.s32.totalorder %s31_s19, %s31_s19 }
   0xb   :  { %p939_p3 = scmp.ne.s32.totalorder %s31_s19, %s938_s29  ;;  %p944_p5 = scmp.lt.s32.totalorder %s938_s29, %s938_s29 }
   0xd   :  { %p945_p6 = por %p944_p5, %p943_p4 }
   0xf   :  { %p946_p7 = pnand %p945_p6, %p939_p3 }
  0x11   :  { %949 = shalt.err (!%p946_p7)
}
  0x12   :  { %s1024_s30 = smov 64   ;;  %s1025_s6 = smov 4  }
  0x13   :  { %36 = dma.hbm_to_vmem [thread:$0]  %s1133_s1, 1024, %s31_s19, [#allocation6], %s1024_s30, %s1024_s30, %s1025_s6  }
  0x14   :  { %s950_s11 = scalar_lea.hbm %s1132_s0, 1024 }
  0x15   :  { %p951_p8 = scmp.ne.s32.totalorder %s1132_s0, %s950_s11  ;;  %p954_p9 = scmp.lt.u32.totalorder %s950_s11, %s1132_s0 }
  0x17   :  { %p956_p10 = pnand %p954_p9, %p951_p8 }
  0x19   :  { %959 = shalt.err (!%p956_p10)
}
  0x1a   :  { %s960_s16 = scalar_lea.vmem %s1059_s21, 1024  ;;  %p965_p12 = scmp.lt.s32.totalorder %s1059_s21, %s1059_s21 }
  0x1b   :  { %p961_p11 = scmp.ne.s32.totalorder %s1059_s21, %s960_s16  ;;  %p966_p13 = scmp.lt.s32.totalorder %s960_s16, %s960_s16 }
  0x1d   :  { %p967_p0 = por %p966_p13, %p965_p12 }
  0x1f   :  { %p968_p1 = pnand %p967_p0, %p961_p11 }
  0x21   :  { %971 = shalt.err (!%p968_p1)
}
  0x22   :  { %24 = dma.hbm_to_vmem [thread:$0]  %s1132_s0, 1024, %s1059_s21, [#allocation3], %s1024_s30, %s1024_s30, %s1025_s6  }
  0x23   :  { %s1026_s18 = smov [#allocation7]   ;;  %s972_s23 = scalar_lea.hbm %s1135_s3, 1024 }
  0x24   :  { %s44_s19 = sshll.u32 %s1026_s18, 4  ;;  %p973_p2 = scmp.ne.s32.totalorder %s1135_s3, %s972_s23  ;;  %s45_s19 = int_to_ptr.vmem [resolvable:$true] %s44_s19 }
  0x25   :  { %p976_p3 = scmp.lt.u32.totalorder %s972_s23, %s1135_s3 }
  0x27   :  { %p978_p4 = pnand %p976_p3, %p973_p2 }
  0x29   :  { %981 = shalt.err (!%p978_p4)
}
  0x2a   :  { %s982_s28 = scalar_lea.vmem %s45_s19, 1024  ;;  %p987_p6 = scmp.lt.s32.totalorder %s45_s19, %s45_s19 }
  0x2b   :  { %p983_p5 = scmp.ne.s32.totalorder %s45_s19, %s982_s28  ;;  %p988_p7 = scmp.lt.s32.totalorder %s982_s28, %s982_s28 }
  0x2d   :  { %p989_p8 = por %p988_p7, %p987_p6 }
  0x2f   :  { %p990_p9 = pnand %p989_p8, %p983_p5 }
  0x31   :  { %993 = shalt.err (!%p990_p9)
}
  0x32   :  { %50 = dma.hbm_to_vmem [thread:$0]  %s1135_s3, 1024, %s45_s19, [#allocation6], %s1024_s30, %s1024_s30, %s1025_s6  }
  0x33   :  { %1016 = dma.done.wait [#allocation3], 1024  }
  0x34   :  { %1017 = vsyncadd [#allocation3], 4294966272 }
  0x35   :  { %1018 = dma.done.wait [#allocation6], 2048  }
  0x36   :  { %1019 = vsyncadd [#allocation6], 4294965248  ;;  %v900_v0 = vld [vmem:[#allocation5] sm:$0xff]   ;;  %v901_v1 = vld [vmem:[#allocation5 + $0x8] sm:$0xff]  }
  0x37   :  { %829 = vmatprep.subr.bf16.mxu0 %v900_v0  ;;  %v902_v2 = vld [vmem:[#allocation5 + $0x10] sm:$0xff]   ;;  %v903_v3 = vld [vmem:[#allocation5 + $0x18] sm:$0xff]   ;;  %v908_v4 = vld [vmem:[#allocation2] sm:$0xff]  }
  0x38   :  { %830 = vmatpush3.bf16.msra.mxu0 %v900_v0  ;;  %845 = vmatprep.mubr.bf16.mxu0 %v908_v4  ;;  %v904_v5 = vld [vmem:[#allocation5 + $0x20] sm:$0xff]   ;;  %v905_v6 = vld [vmem:[#allocation5 + $0x28] sm:$0xff]   ;;  %v906_v9 = vld [vmem:[#allocation5 + $0x30] sm:$0xff]  }
  0x39   :  { %831 = vmatprep.subr.bf16.mxu0 %v901_v1  ;;  %v916_v7 = vld [vmem:[#allocation7] sm:$0xff]   ;;  %v917_v8 = vld [vmem:[#allocation7 + $0x8] sm:$0xff]   ;;  %v918_v10 = vld [vmem:[#allocation7 + $0x10] sm:$0xff]  }
  0x3a   :  { %861 = vmatprep.subr.bf16.mxu1 %v916_v7  ;;  %v907_v11 = vld [vmem:[#allocation5 + $0x38] sm:$0xff]   ;;  %v920_v13 = vld [vmem:[#allocation7 + $0x20] sm:$0xff]   ;;  %v909_v14 = vld [vmem:[#allocation2 + $0x8] sm:$0xff]  }
  0x3b   :  { %862 = vmatpush3.bf16.msra.mxu1 %v916_v7  ;;  %v919_v12 = vld [vmem:[#allocation7 + $0x18] sm:$0xff]   ;;  %v910_v15 = vld [vmem:[#allocation2 + $0x10] sm:$0xff]   ;;  %v921_v16 = vld [vmem:[#allocation7 + $0x28] sm:$0xff]  }
  0x3c   :  { %832 = vmatpush3.bf16.msra.mxu0 %v901_v1  ;;  %863 = vmatprep.subr.bf16.mxu1 %v917_v8  ;;  %v911_v17 = vld [vmem:[#allocation2 + $0x18] sm:$0xff]   ;;  %v912_v18 = vld [vmem:[#allocation2 + $0x20] sm:$0xff]   ;;  %v913_v19 = vld [vmem:[#allocation2 + $0x28] sm:$0xff]  }
  0x3d   :  { %833 = vmatprep.subr.bf16.mxu0 %v902_v2  ;;  %v914_v20 = vld [vmem:[#allocation2 + $0x30] sm:$0xff]   ;;  %v915_v21 = vld [vmem:[#allocation2 + $0x38] sm:$0xff]   ;;  %v748_v24 = vld [vmem:[%s1134_s2] ss:$0 sm:$0xff] }
  0x3e   :  { %v922_v22 = vld [vmem:[#allocation7 + $0x30] sm:$0xff]   ;;  %v923_v23 = vld [vmem:[#allocation7 + $0x38] sm:$0xff]  }
  0x3f   :  { %864 = vmatpush3.bf16.msra.mxu1 %v917_v8 }
  0x40   :  { %834 = vmatpush3.bf16.msra.mxu0 %v902_v2  ;;  %865 = vmatprep.subr.bf16.mxu1 %v918_v10 }
  0x41   :  { %835 = vmatprep.subr.bf16.mxu0 %v903_v3 }
  0x43   :  { %866 = vmatpush3.bf16.msra.mxu1 %v918_v10 }
  0x44   :  { %836 = vmatpush3.bf16.msra.mxu0 %v903_v3  ;;  %867 = vmatprep.subr.bf16.mxu1 %v919_v12 }
  0x45   :  { %837 = vmatprep.subr.bf16.mxu0 %v904_v5 }
  0x47   :  { %868 = vmatpush3.bf16.msra.mxu1 %v919_v12 }
  0x48   :  { %838 = vmatpush3.bf16.msra.mxu0 %v904_v5  ;;  %869 = vmatprep.subr.bf16.mxu1 %v920_v13 }
  0x49   :  { %839 = vmatprep.subr.bf16.mxu0 %v905_v6 }
  0x4b   :  { %870 = vmatpush3.bf16.msra.mxu1 %v920_v13 }
  0x4c   :  { %840 = vmatpush3.bf16.msra.mxu0 %v905_v6  ;;  %871 = vmatprep.subr.bf16.mxu1 %v921_v16 }
  0x4d   :  { %841 = vmatprep.subr.bf16.mxu0 %v906_v9 }
  0x4f   :  { %872 = vmatpush3.bf16.msra.mxu1 %v921_v16 }
  0x50   :  { %842 = vmatpush3.bf16.msra.mxu0 %v906_v9  ;;  %873 = vmatprep.subr.bf16.mxu1 %v922_v22 }
  0x51   :  { %843 = vmatprep.subr.bf16.mxu0 %v907_v11 }
  0x53   :  { %874 = vmatpush3.bf16.msra.mxu1 %v922_v22 }
  0x54   :  { %844 = vmatpush3.bf16.msra.mxu0 %v907_v11  ;;  %875 = vmatprep.subr.bf16.mxu1 %v923_v23 }
  0x57   :  { %846 = vmatmul.mubr.bf16.vlgmr.msra.gmra.mrb[0].mxu0 %v909_v14  ;;  %876 = vmatpush3.bf16.msra.mxu1 %v923_v23 }
  0x58   :  { %849 = vmatprep.mubr.bf16.mxu0 %v910_v15 }
  0x5f   :  { %850 = vmatmul.mubr.bf16.gmra.mrb[4].mxu0 %v911_v17  ;;  %v765_v17 = vld [vmem:[%s1136_s4] ss:$0 sm:$0xff]  ;;  %s1028_s4 = smov [#allocation8]  }
  0x60   :  { %853 = vmatprep.mubr.bf16.mxu0 %v912_v18  ;;  %s735_s8 = sshll.u32 %s1028_s4, 4  ;;  %s736_s8 = int_to_ptr.vmem [resolvable:$true] %s735_s8 }
  0x61   :  { %s994_s9 = scalar_lea.vmem %s736_s8, 1024  ;;  %p999_p11 = scmp.lt.s32.totalorder %s736_s8, %s736_s8 }
  0x62   :  { %p995_p10 = scmp.ne.s32.totalorder %s736_s8, %s994_s9  ;;  %p1000_p12 = scmp.lt.s32.totalorder %s994_s9, %s994_s9 }
  0x64   :  { %p1001_p13 = por %p1000_p12, %p999_p11 }
  0x66   :  { %p1002_p0 = pnand %p1001_p13, %p995_p10 }
  0x67   :  { %854 = vmatmul.mubr.bf16.gmra.mrb[8].mxu0 %v913_v19 }
  0x68   :  { %857 = vmatprep.mubr.bf16.mxu0 %v914_v20 }
  0x6f   :  { %858 = vmatmul.mubr.bf16.gmra.mrb[12].mxu0 %v915_v21 }
 0x12a   :  { %v847_v25 = vpop.f32.mrb[0].mxu0 }
 0x12b   :  { %v241_v26 = vadd.f32 %v847_v25, %v748_v24  ;;  %v232_v27 = vpop.f32.mrb[1].mxu0 }
 0x12c   :  { %v233_v28 = vadd.f32 %v748_v24, %v232_v27  ;;  %v848_v29 = vpop.f32.mrb[2].mxu0 }
 0x12d   :  { %v244_v30 = vadd.f32 %v848_v29, %v748_v24  ;;  %v235_v31 = vpop.f32.mrb[3].mxu0  ;;  %v297_v33 = vmax.f32 %v241_v26, 0.0 }
 0x12e   :  { %v236_v32 = vadd.f32 %v748_v24, %v235_v31  ;;  %v295_v35 = vmax.f32 %v233_v28, 0.0 }
 0x12f   :  { %v298_v34 = vmax.f32 %v244_v30, 0.0 }
 0x130   :  { %v296_v36 = vmax.f32 %v236_v32, 0.0 }
 0x131   :  { %v312_v37 = vpack.c.bf16 %v298_v34, %v297_v33 }
 0x132   :  { %v311_v38 = vpack.c.bf16 %v296_v36, %v295_v35  ;;  %v851_v39 = vpop.f32.mrb[4].mxu0 }
 0x133   :  { %v257_v40 = vadd.f32 %v851_v39, %v748_v24  ;;  %v248_v41 = vpop.f32.mrb[5].mxu0 }
 0x134   :  { %877 = vmatprep.mubr.bf16.mxu1 %v311_v38  ;;  %v249_v42 = vadd.f32 %v748_v24, %v248_v41  ;;  %v852_v43 = vpop.f32.mrb[6].mxu0  ;;  %v1027_v38 = vmov 0.0|0.0  }
 0x135   :  { %878 = vmatmul.mubr.bf16.vlgmr.msra.gmra.mrb[0].mxu1 %v312_v37  ;;  %v301_v44 = vmax.f32 %v257_v40, 0.0  ;;  %v260_v45 = vadd.f32 %v852_v43, %v748_v24  ;;  %v251_v46 = vpop.f32.mrb[7].mxu0  ;;  %v776_v39 = vcombine.low %v1027_v38, %v1027_v38  ;;  %v777_v40 = vcombine.high %v1027_v38, %v1027_v38 }
 0x136   :  { %v299_v47 = vmax.f32 %v249_v42, 0.0  ;;  %v252_v48 = vadd.f32 %v748_v24, %v251_v46 }
 0x137   :  { %v302_v49 = vmax.f32 %v260_v45, 0.0  ;;  %716 = vst [vmem:[#allocation8 + $0x8] sm:$0xf] %v776_v39  ;;  %717 = vst [vmem:[#allocation8 + $0xc] sm:$0xf] %v777_v40 }
 0x138   :  { %v300_v50 = vmax.f32 %v252_v48, 0.0  ;;  %718 = vst [vmem:[#allocation8 + $0x10] sm:$0xf] %v776_v39  ;;  %719 = vst [vmem:[#allocation8 + $0x14] sm:$0xf] %v777_v40 }
 0x139   :  { %v314_v51 = vpack.c.bf16 %v302_v49, %v301_v44  ;;  %720 = vst [vmem:[#allocation8 + $0x18] sm:$0xf] %v776_v39  ;;  %721 = vst [vmem:[#allocation8 + $0x1c] sm:$0xf] %v777_v40 }
 0x13a   :  { %v313_v52 = vpack.c.bf16 %v300_v50, %v299_v47  ;;  %v855_v53 = vpop.f32.mrb[8].mxu0  ;;  %722 = vst [vmem:[#allocation8 + $0x20] sm:$0xf] %v776_v39  ;;  %723 = vst [vmem:[#allocation8 + $0x24] sm:$0xf] %v777_v40 }
 0x13b   :  { %v273_v54 = vadd.f32 %v855_v53, %v748_v24  ;;  %v264_v55 = vpop.f32.mrb[9].mxu0  ;;  %724 = vst [vmem:[#allocation8 + $0x28] sm:$0xf] %v776_v39  ;;  %725 = vst [vmem:[#allocation8 + $0x2c] sm:$0xf] %v777_v40 }
 0x13c   :  { %v265_v56 = vadd.f32 %v748_v24, %v264_v55  ;;  %v856_v57 = vpop.f32.mrb[10].mxu0  ;;  %881 = vmatprep.mubr.bf16.mxu1 %v313_v52  ;;  %726 = vst [vmem:[#allocation8 + $0x30] sm:$0xf] %v776_v39  ;;  %727 = vst [vmem:[#allocation8 + $0x34] sm:$0xf] %v777_v40 }
 0x13d   :  { %v305_v58 = vmax.f32 %v273_v54, 0.0  ;;  %v276_v59 = vadd.f32 %v856_v57, %v748_v24  ;;  %v267_v60 = vpop.f32.mrb[11].mxu0  ;;  %882 = vmatmul.mubr.bf16.gmra.mrb[4].mxu1 %v314_v51  ;;  %728 = vst [vmem:[#allocation8 + $0x38] sm:$0xf] %v776_v39  ;;  %729 = vst [vmem:[#allocation8 + $0x3c] sm:$0xf] %v777_v40 }
 0x13e   :  { %v303_v61 = vmax.f32 %v265_v56, 0.0  ;;  %v268_v62 = vadd.f32 %v748_v24, %v267_v60 }
 0x13f   :  { %v306_v63 = vmax.f32 %v276_v59, 0.0 }
 0x140   :  { %v304_v0 = vmax.f32 %v268_v62, 0.0 }
 0x141   :  { %v316_v1 = vpack.c.bf16 %v306_v63, %v305_v58 }
 0x142   :  { %v315_v2 = vpack.c.bf16 %v304_v0, %v303_v61  ;;  %v859_v3 = vpop.f32.mrb[12].mxu0 }
 0x143   :  { %v289_v4 = vadd.f32 %v859_v3, %v748_v24  ;;  %v280_v5 = vpop.f32.mrb[13].mxu0 }
 0x144   :  { %v281_v6 = vadd.f32 %v748_v24, %v280_v5  ;;  %v860_v7 = vpop.f32.mrb[14].mxu0  ;;  %885 = vmatprep.mubr.bf16.mxu1 %v315_v2 }
 0x145   :  { %v309_v8 = vmax.f32 %v289_v4, 0.0  ;;  %v292_v9 = vadd.f32 %v860_v7, %v748_v24  ;;  %v283_v10 = vpop.f32.mrb[15].mxu0  ;;  %886 = vmatmul.mubr.bf16.gmra.mrb[8].mxu1 %v316_v1 }
 0x146   :  { %v307_v11 = vmax.f32 %v281_v6, 0.0  ;;  %v284_v12 = vadd.f32 %v748_v24, %v283_v10 }
 0x147   :  { %v310_v13 = vmax.f32 %v292_v9, 0.0 }
 0x148   :  { %v308_v14 = vmax.f32 %v284_v12, 0.0 }
 0x149   :  { %v318_v15 = vpack.c.bf16 %v310_v13, %v309_v8 }
 0x14a   :  { %v317_v16 = vpack.c.bf16 %v308_v14, %v307_v11 }
 0x14c   :  { %889 = vmatprep.mubr.bf16.mxu1 %v317_v16 }
 0x14d   :  { %890 = vmatmul.mubr.bf16.gmra.mrb[12].mxu1 %v318_v15 }
 0x208   :  { %v879_v18 = vpop.f32.mrb[0].mxu1 }
 0x209   :  { %v424_v19 = vpop.f32.mrb[1].mxu1 }
 0x20a   :  { %v425_v20 = vadd.f32 %v765_v17, %v424_v19  ;;  %v880_v21 = vpop.f32.mrb[2].mxu1 }
 0x20b   :  { %v427_v22 = vpop.f32.mrb[3].mxu1 }
 0x20c   :  { %v428_v23 = vadd.f32 %v765_v17, %v427_v22  ;;  %v487_v25 = vmul.f32 %v425_v20, %v425_v20 }
 0x20e   :  { %503 = vadd.xlane.f32.xlu0 %v487_v25  ;;  %v488_v26 = vmul.f32 %v428_v23, %v428_v23 }
 0x210   :  { %v883_v24 = vpop.f32.mrb[4].mxu1 }
 0x211   :  { %v440_v27 = vpop.f32.mrb[5].mxu1 }
 0x212   :  { %505 = vadd.xlane.f32.xlu0 %v488_v26  ;;  %v884_v28 = vpop.f32.mrb[6].mxu1 }
 0x213   :  { %v443_v29 = vpop.f32.mrb[7].mxu1 }
 0x218   :  { %v887_v30 = vpop.f32.mrb[8].mxu1 }
 0x219   :  { %v456_v31 = vpop.f32.mrb[9].mxu1 }
 0x21a   :  { %v888_v32 = vpop.f32.mrb[10].mxu1 }
 0x21b   :  { %v459_v33 = vpop.f32.mrb[11].mxu1 }
 0x220   :  { %v891_v34 = vpop.f32.mrb[12].mxu1 }
 0x221   :  { %v472_v35 = vpop.f32.mrb[13].mxu1 }
 0x222   :  { %v892_v36 = vpop.f32.mrb[14].mxu1 }
 0x223   :  { %v475_v37 = vpop.f32.mrb[15].mxu1 }
 0x29b   :  { %v504_v41 = vpop.xlane.xlu0 %503 }
 0x29c   :  { %v535_v42 = vmax.f32 %v504_v41, 1e-24 }
 0x29e   :  { %924 = vrsqrt.f32 %v535_v42 }
 0x29f   :  { %v506_v43 = vpop.xlane.xlu0 %505 }
 0x2a0   :  { %v536_v44 = vmax.f32 %v506_v43, 1e-24 }
 0x2a2   :  { %926 = vrsqrt.f32 %v536_v44 }
 0x2a8   :  { %v925_v45 = vpop.eup %924 }
 0x2a9   :  { %v567_v47 = vmul.f32 %v925_v45, %v425_v20 }
 0x2ac   :  { %v927_v46 = vpop.eup %926 }
 0x2ad   :  { %v568_v48 = vmul.f32 %v927_v46, %v428_v23 }
 0x2af   :  { %v795_v49 = vpack.c.bf16 %v568_v48, %v567_v47 }
 0x2b1   :  { %796 = vst [vmem:[#allocation8] sm:$0xff] %v795_v49  }
 0x2b2   :  { %1005 = shalt.err (!%p1002_p0)
}
 0x2b3   :  { %s1006_s12 = scalar_lea.hbm %s1137_s5, 1024 }
 0x2b4   :  { %p1007_p1 = scmp.ne.s32.totalorder %s1137_s5, %s1006_s12  ;;  %p1010_p2 = scmp.lt.u32.totalorder %s1006_s12, %s1137_s5 }
 0x2b6   :  { %p1012_p3 = pnand %p1010_p2, %p1007_p1 }
 0x2b8   :  { %1015 = shalt.err (!%p1012_p3)
}
 0x2b9   :  { %741 = dma.vmem_to_hbm [thread:$0]  %s736_s8, 1024, %s1137_s5, [#allocation4], %s1024_s30, %s1024_s30, %s1025_s6  }
 0x2ba   :  { %1020 = dma.done.wait [#allocation4], 1024  }
 0x2bb   :  { %1021 = vsyncadd [#allocation4], 4294966272 }
 0x2bc   :  { %745 = vsyncpa [#allocation3], 1 }
 0x2bd   :  { %746 = vsyncpa [#allocation6], 1 }
 0x2be   :  { %747 = vsyncpa [#allocation4], 1 }

// kernel: tpu_custom_call.1
= control target key start
LH: loop header
LB: loop body
LE: loop exit
PB: predicated region body
PF: predicated region fallthrough
CT: control target
= control target key end

     0   :  { %10 = vsyncpa [#allocation3], 0  ;;  %s1132_s0 = inlined_call_operand.hbm [shape: bf16[128,128], index: 0, kind: input, shape index: {}]   ;;  %s1133_s1 = inlined_call_operand.hbm [shape: bf16[128,128], index: 1, kind: input, shape index: {}]   ;;  %s1134_s2 = inlined_call_operand.vmem [shape: f32[1,128], index: 2, kind: input, shape index: {}]   ;;  %s1135_s3 = inlined_call_operand.hbm [shape: bf16[128,128], index: 3, kind: input, shape index: {}]   ;;  %s1136_s4 = inlined_call_operand.vmem [shape: f32[1,128], index: 4, kind: input, shape index: {}]   ;;  %s1137_s5 = inlined_call_operand.hbm [shape: bf16[128,128], index: 5, kind: output, shape index: {}]  }
   0x1   :  { %11 = vsyncpa [#allocation6], 0 }
   0x2   :  { %12 = vsyncpa [#allocation4], 0  ;;  %s1022_s18 = smov [#allocation5]   ;;  %s1023_s20 = smov [#allocation2]  }
   0x3   :  { %s30_s19 = sshll.u32 %s1022_s18, 4  ;;  %s18_s21 = sshll.u32 %s1023_s20, 4  ;;  %s31_s19 = int_to_ptr.vmem [resolvable:$true] %s30_s19  ;;  %s1059_s21 = int_to_ptr.vmem [resolvable:$true] %s18_s21 }
   0x4   :  { %s928_s24 = scalar_lea.hbm %s1133_s1, 1024 }
   0x5   :  { %p929_p0 = scmp.ne.s32.totalorder %s1133_s1, %s928_s24  ;;  %p932_p1 = scmp.lt.u32.totalorder %s928_s24, %s1133_s1 }
   0x7   :  { %p934_p2 = pnand %p932_p1, %p929_p0 }
   0x9   :  { %937 = shalt.err (!%p934_p2)
}
   0xa   :  { %s938_s29 = scalar_lea.vmem %s31_s19, 1024  ;;  %p943_p4 = scmp.lt.s32.totalorder %s31_s19, %s31_s19 }
   0xb   :  { %p939_p3 = scmp.ne.s32.totalorder %s31_s19, %s938_s29  ;;  %p944_p5 = scmp.lt.s32.totalorder %s938_s29, %s938_s29 }
   0xd   :  { %p945_p6 = por %p944_p5, %p943_p4 }
   0xf   :  { %p946_p7 = pnand %p945_p6, %p939_p3 }
  0x11   :  { %949 = shalt.err (!%p946_p7)
}
  0x12   :  { %s1024_s30 = smov 64   ;;  %s1025_s6 = smov 4  }
  0x13   :  { %36 = dma.hbm_to_vmem [thread:$0]  %s1133_s1, 1024, %s31_s19, [#allocation6], %s1024_s30, %s1024_s30, %s1025_s6  }
  0x14   :  { %s950_s11 = scalar_lea.hbm %s1132_s0, 1024 }
  0x15   :  { %p951_p8 = scmp.ne.s32.totalorder %s1132_s0, %s950_s11  ;;  %p954_p9 = scmp.lt.u32.totalorder %s950_s11, %s1132_s0 }
  0x17   :  { %p956_p10 = pnand %p954_p9, %p951_p8 }
  0x19   :  { %959 = shalt.err (!%p956_p10)
}
  0x1a   :  { %s960_s16 = scalar_lea.vmem %s1059_s21, 1024  ;;  %p965_p12 = scmp.lt.s32.totalorder %s1059_s21, %s1059_s21 }
  0x1b   :  { %p961_p11 = scmp.ne.s32.totalorder %s1059_s21, %s960_s16  ;;  %p966_p13 = scmp.lt.s32.totalorder %s960_s16, %s960_s16 }
  0x1d   :  { %p967_p0 = por %p966_p13, %p965_p12 }
  0x1f   :  { %p968_p1 = pnand %p967_p0, %p961_p11 }
  0x21   :  { %971 = shalt.err (!%p968_p1)
}
  0x22   :  { %24 = dma.hbm_to_vmem [thread:$0]  %s1132_s0, 1024, %s1059_s21, [#allocation3], %s1024_s30, %s1024_s30, %s1025_s6  }
  0x23   :  { %s1026_s18 = smov [#allocation7]   ;;  %s972_s23 = scalar_lea.hbm %s1135_s3, 1024 }
  0x24   :  { %s44_s19 = sshll.u32 %s1026_s18, 4  ;;  %p973_p2 = scmp.ne.s32.totalorder %s1135_s3, %s972_s23  ;;  %s45_s19 = int_to_ptr.vmem [resolvable:$true] %s44_s19 }
  0x25   :  { %p976_p3 = scmp.lt.u32.totalorder %s972_s23, %s1135_s3 }
  0x27   :  { %p978_p4 = pnand %p976_p3, %p973_p2 }
  0x29   :  { %981 = shalt.err (!%p978_p4)
}
  0x2a   :  { %s982_s28 = scalar_lea.vmem %s45_s19, 1024  ;;  %p987_p6 = scmp.lt.s32.totalorder %s45_s19, %s45_s19 }
  0x2b   :  { %p983_p5 = scmp.ne.s32.totalorder %s45_s19, %s982_s28  ;;  %p988_p7 = scmp.lt.s32.totalorder %s982_s28, %s982_s28 }
  0x2d   :  { %p989_p8 = por %p988_p7, %p987_p6 }
  0x2f   :  { %p990_p9 = pnand %p989_p8, %p983_p5 }
  0x31   :  { %993 = shalt.err (!%p990_p9)
}
  0x32   :  { %50 = dma.hbm_to_vmem [thread:$0]  %s1135_s3, 1024, %s45_s19, [#allocation6], %s1024_s30, %s1024_s30, %s1025_s6  }
  0x33   :  { %1016 = dma.done.wait [#allocation3], 1024  }
  0x34   :  { %1017 = vsyncadd [#allocation3], 4294966272 }
  0x35   :  { %1018 = dma.done.wait [#allocation6], 2048  }
  0x36   :  { %1019 = vsyncadd [#allocation6], 4294965248  ;;  %v900_v0 = vld [vmem:[#allocation5] sm:$0xff]   ;;  %v901_v1 = vld [vmem:[#allocation5 + $0x8] sm:$0xff]  }
  0x37   :  { %829 = vmatprep.subr.bf16.mxu0 %v900_v0  ;;  %v902_v2 = vld [vmem:[#allocation5 + $0x10] sm:$0xff]   ;;  %v903_v3 = vld [vmem:[#allocation5 + $0x18] sm:$0xff]   ;;  %v908_v4 = vld [vmem:[#allocation2] sm:$0xff]  }
  0x38   :  { %830 = vmatpush3.bf16.msra.mxu0 %v900_v0  ;;  %845 = vmatprep.mubr.bf16.mxu0 %v908_v4  ;;  %v904_v5 = vld [vmem:[#allocation5 + $0x20] sm:$0xff]   ;;  %v905_v6 = vld [vmem:[#allocation5 + $0x28] sm:$0xff]   ;;  %v906_v9 = vld [vmem:[#allocation5 + $0x30] sm:$0xff]  }
  0x39   :  { %831 = vmatprep.subr.bf16.mxu0 %v901_v1  ;;  %v916_v7 = vld [vmem:[#allocation7] sm:$0xff]   ;;  %v917_v8 = vld [vmem:[#allocation7 + $0x8] sm:$0xff]   ;;  %v918_v10 = vld [vmem:[#allocation7 + $0x10] sm:$0xff]  }
  0x3a   :  { %861 = vmatprep.subr.bf16.mxu1 %v916_v7  ;;  %v907_v11 = vld [vmem:[#allocation5 + $0x38] sm:$0xff]   ;;  %v920_v13 = vld [vmem:[#allocation7 + $0x20] sm:$0xff]   ;;  %v909_v14 = vld [vmem:[#allocation2 + $0x8] sm:$0xff]  }
  0x3b   :  { %862 = vmatpush3.bf16.msra.mxu1 %v916_v7  ;;  %v919_v12 = vld [vmem:[#allocation7 + $0x18] sm:$0xff]   ;;  %v910_v15 = vld [vmem:[#allocation2 + $0x10] sm:$0xff]   ;;  %v921_v16 = vld [vmem:[#allocation7 + $0x28] sm:$0xff]  }
  0x3c   :  { %832 = vmatpush3.bf16.msra.mxu0 %v901_v1  ;;  %863 = vmatprep.subr.bf16.mxu1 %v917_v8  ;;  %v911_v17 = vld [vmem:[#allocation2 + $0x18] sm:$0xff]   ;;  %v912_v18 = vld [vmem:[#allocation2 + $0x20] sm:$0xff]   ;;  %v913_v19 = vld [vmem:[#allocation2 + $0x28] sm:$0xff]  }
  0x3d   :  { %833 = vmatprep.subr.bf16.mxu0 %v902_v2  ;;  %v914_v20 = vld [vmem:[#allocation2 + $0x30] sm:$0xff]   ;;  %v915_v21 = vld [vmem:[#allocation2 + $0x38] sm:$0xff]   ;;  %v748_v24 = vld [vmem:[%s1134_s2] ss:$0 sm:$0xff] }
  0x3e   :  { %v922_v22 = vld [vmem:[#allocation7 + $0x30] sm:$0xff]   ;;  %v923_v23 = vld [vmem:[#allocation7 + $0x38] sm:$0xff]  }
  0x3f   :  { %864 = vmatpush3.bf16.msra.mxu1 %v917_v8 }
  0x40   :  { %834 = vmatpush3.bf16.msra.mxu0 %v902_v2  ;;  %865 = vmatprep.subr.bf16.mxu1 %v918_v10 }
  0x41   :  { %835 = vmatprep.subr.bf16.mxu0 %v903_v3 }
  0x43   :  { %866 = vmatpush3.bf16.msra.mxu1 %v918_v10 }
  0x44   :  { %836 = vmatpush3.bf16.msra.mxu0 %v903_v3  ;;  %867 = vmatprep.subr.bf16.mxu1 %v919_v12 }
  0x45   :  { %837 = vmatprep.subr.bf16.mxu0 %v904_v5 }
  0x47   :  { %868 = vmatpush3.bf16.msra.mxu1 %v919_v12 }
  0x48   :  { %838 = vmatpush3.bf16.msra.mxu0 %v904_v5  ;;  %869 = vmatprep.subr.bf16.mxu1 %v920_v13 }
  0x49   :  { %839 = vmatprep.subr.bf16.mxu0 %v905_v6 }
  0x4b   :  { %870 = vmatpush3.bf16.msra.mxu1 %v920_v13 }
  0x4c   :  { %840 = vmatpush3.bf16.msra.mxu0 %v905_v6  ;;  %871 = vmatprep.subr.bf16.mxu1 %v921_v16 }
  0x4d   :  { %841 = vmatprep.subr.bf16.mxu0 %v906_v9 }
  0x4f   :  { %872 = vmatpush3.bf16.msra.mxu1 %v921_v16 }
  0x50   :  { %842 = vmatpush3.bf16.msra.mxu0 %v906_v9  ;;  %873 = vmatprep.subr.bf16.mxu1 %v922_v22 }
  0x51   :  { %843 = vmatprep.subr.bf16.mxu0 %v907_v11 }
  0x53   :  { %874 = vmatpush3.bf16.msra.mxu1 %v922_v22 }
  0x54   :  { %844 = vmatpush3.bf16.msra.mxu0 %v907_v11  ;;  %875 = vmatprep.subr.bf16.mxu1 %v923_v23 }
  0x57   :  { %846 = vmatmul.mubr.bf16.vlgmr.msra.gmra.mrb[0].mxu0 %v909_v14  ;;  %876 = vmatpush3.bf16.msra.mxu1 %v923_v23 }
  0x58   :  { %849 = vmatprep.mubr.bf16.mxu0 %v910_v15 }
  0x5f   :  { %850 = vmatmul.mubr.bf16.gmra.mrb[4].mxu0 %v911_v17  ;;  %v765_v17 = vld [vmem:[%s1136_s4] ss:$0 sm:$0xff]  ;;  %s1028_s4 = smov [#allocation8]  }
  0x60   :  { %853 = vmatprep.mubr.bf16.mxu0 %v912_v18  ;;  %s735_s8 = sshll.u32 %s1028_s4, 4  ;;  %s736_s8 = int_to_ptr.vmem [resolvable:$true] %s735_s8 }
  0x61   :  { %s994_s9 = scalar_lea.vmem %s736_s8, 1024  ;;  %p999_p11 = scmp.lt.s32.totalorder %s736_s8, %s736_s8 }
  0x62   :  { %p995_p10 = scmp.ne.s32.totalorder %s736_s8, %s994_s9  ;;  %p1000_p12 = scmp.lt.s32.totalorder %s994_s9, %s994_s9 }
  0x64   :  { %p1001_p13 = por %p1000_p12, %p999_p11 }
  0x66   :  { %p1002_p0 = pnand %p1001_p13, %p995_p10 }
  0x67   :  { %854 = vmatmul.mubr.bf16.gmra.mrb[8].mxu0 %v913_v19 }
  0x68   :  { %857 = vmatprep.mubr.bf16.mxu0 %v914_v20 }
  0x6f   :  { %858 = vmatmul.mubr.bf16.gmra.mrb[12].mxu0 %v915_v21 }
 0x12a   :  { %v847_v25 = vpop.f32.mrb[0].mxu0 }
 0x12b   :  { %v241_v26 = vadd.f32 %v847_v25, %v748_v24  ;;  %v232_v27 = vpop.f32.mrb[1].mxu0 }
 0x12c   :  { %v233_v28 = vadd.f32 %v748_v24, %v232_v27  ;;  %v848_v29 = vpop.f32.mrb[2].mxu0 }
 0x12d   :  { %v244_v30 = vadd.f32 %v848_v29, %v748_v24  ;;  %v235_v31 = vpop.f32.mrb[3].mxu0  ;;  %v297_v33 = vmax.f32 %v241_v26, 0.0 }
 0x12e   :  { %v236_v32 = vadd.f32 %v748_v24, %v235_v31  ;;  %v295_v35 = vmax.f32 %v233_v28, 0.0 }
 0x12f   :  { %v298_v34 = vmax.f32 %v244_v30, 0.0 }
 0x130   :  { %v296_v36 = vmax.f32 %v236_v32, 0.0 }
 0x131   :  { %v312_v37 = vpack.c.bf16 %v298_v34, %v297_v33 }
 0x132   :  { %v311_v38 = vpack.c.bf16 %v296_v36, %v295_v35  ;;  %v851_v39 = vpop.f32.mrb[4].mxu0 }
 0x133   :  { %v257_v40 = vadd.f32 %v851_v39, %v748_v24  ;;  %v248_v41 = vpop.f32.mrb[5].mxu0 }
 0x134   :  { %877 = vmatprep.mubr.bf16.mxu1 %v311_v38  ;;  %v249_v42 = vadd.f32 %v748_v24, %v248_v41  ;;  %v852_v43 = vpop.f32.mrb[6].mxu0  ;;  %v1027_v38 = vmov 0.0|0.0  }
 0x135   :  { %878 = vmatmul.mubr.bf16.vlgmr.msra.gmra.mrb[0].mxu1 %v312_v37  ;;  %v301_v44 = vmax.f32 %v257_v40, 0.0  ;;  %v260_v45 = vadd.f32 %v852_v43, %v748_v24  ;;  %v251_v46 = vpop.f32.mrb[7].mxu0  ;;  %v776_v39 = vcombine.low %v1027_v38, %v1027_v38  ;;  %v777_v40 = vcombine.high %v1027_v38, %v1027_v38 }
 0x136   :  { %v299_v47 = vmax.f32 %v249_v42, 0.0  ;;  %v252_v48 = vadd.f32 %v748_v24, %v251_v46 }
 0x137   :  { %v302_v49 = vmax.f32 %v260_v45, 0.0  ;;  %716 = vst [vmem:[#allocation8 + $0x8] sm:$0xf] %v776_v39  ;;  %717 = vst [vmem:[#allocation8 + $0xc] sm:$0xf] %v777_v40 }
 0x138   :  { %v300_v50 = vmax.f32 %v252_v48, 0.0  ;;  %718 = vst [vmem:[#allocation8 + $0x10] sm:$0xf] %v776_v39  ;;  %719 = vst [vmem:[#allocation8 + $0x14] sm:$0xf] %v777_v40 }
 0x139   :  { %v314_v51 = vpack.c.bf16 %v302_v49, %v301_v44  ;;  %720 = vst [vmem:[#allocation8 + $0x18] sm:$0xf] %v776_v39  ;;  %721 = vst [vmem:[#allocation8 + $0x1c] sm:$0xf] %v777_v40 }
 0x13a   :  { %v313_v52 = vpack.c.bf16 %v300_v50, %v299_v47  ;;  %v855_v53 = vpop.f32.mrb[8].mxu0  ;;  %722 = vst [vmem:[#allocation8 + $0x20] sm:$0xf] %v776_v39  ;;  %723 = vst [vmem:[#allocation8 + $0x24] sm:$0xf] %v777_v40 }
 0x13b   :  { %v273_v54 = vadd.f32 %v855_v53, %v748_v24  ;;  %v264_v55 = vpop.f32.mrb[9].mxu0  ;;  %724 = vst [vmem:[#allocation8 + $0x28] sm:$0xf] %v776_v39  ;;  %725 = vst [vmem:[#allocation8 + $0x2c] sm:$0xf] %v777_v40 }
 0x13c   :  { %v265_v56 = vadd.f32 %v748_v24, %v264_v55  ;;  %v856_v57 = vpop.f32.mrb[10].mxu0  ;;  %881 = vmatprep.mubr.bf16.mxu1 %v313_v52  ;;  %726 = vst [vmem:[#allocation8 + $0x30] sm:$0xf] %v776_v39  ;;  %727 = vst [vmem:[#allocation8 + $0x34] sm:$0xf] %v777_v40 }
 0x13d   :  { %v305_v58 = vmax.f32 %v273_v54, 0.0  ;;  %v276_v59 = vadd.f32 %v856_v57, %v748_v24  ;;  %v267_v60 = vpop.f32.mrb[11].mxu0  ;;  %882 = vmatmul.mubr.bf16.gmra.mrb[4].mxu1 %v314_v51  ;;  %728 = vst [vmem:[#allocation8 + $0x38] sm:$0xf] %v776_v39  ;;  %729 = vst [vmem:[#allocation8 + $0x3c] sm:$0xf] %v777_v40 }
 0x13e   :  { %v303_v61 = vmax.f32 %v265_v56, 0.0  ;;  %v268_v62 = vadd.f32 %v748_v24, %v267_v60 }
 0x13f   :  { %v306_v63 = vmax.f32 %v276_v59, 0.0 }
 0x140   :  { %v304_v0 = vmax.f32 %v268_v62, 0.0 }
 0x141   :  { %v316_v1 = vpack.c.bf16 %v306_v63, %v305_v58 }
 0x142   :  { %v315_v2 = vpack.c.bf16 %v304_v0, %v303_v61  ;;  %v859_v3 = vpop.f32.mrb[12].mxu0 }
 0x143   :  { %v289_v4 = vadd.f32 %v859_v3, %v748_v24  ;;  %v280_v5 = vpop.f32.mrb[13].mxu0 }
 0x144   :  { %v281_v6 = vadd.f32 %v748_v24, %v280_v5  ;;  %v860_v7 = vpop.f32.mrb[14].mxu0  ;;  %885 = vmatprep.mubr.bf16.mxu1 %v315_v2 }
 0x145   :  { %v309_v8 = vmax.f32 %v289_v4, 0.0  ;;  %v292_v9 = vadd.f32 %v860_v7, %v748_v24  ;;  %v283_v10 = vpop.f32.mrb[15].mxu0  ;;  %886 = vmatmul.mubr.bf16.gmra.mrb[8].mxu1 %v316_v1 }
 0x146   :  { %v307_v11 = vmax.f32 %v281_v6, 0.0  ;;  %v284_v12 = vadd.f32 %v748_v24, %v283_v10 }
 0x147   :  { %v310_v13 = vmax.f32 %v292_v9, 0.0 }
 0x148   :  { %v308_v14 = vmax.f32 %v284_v12, 0.0 }
 0x149   :  { %v318_v15 = vpack.c.bf16 %v310_v13, %v309_v8 }
 0x14a   :  { %v317_v16 = vpack.c.bf16 %v308_v14, %v307_v11 }
 0x14c   :  { %889 = vmatprep.mubr.bf16.mxu1 %v317_v16 }
 0x14d   :  { %890 = vmatmul.mubr.bf16.gmra.mrb[12].mxu1 %v318_v15 }
 0x208   :  { %v879_v18 = vpop.f32.mrb[0].mxu1 }
 0x209   :  { %v424_v19 = vpop.f32.mrb[1].mxu1 }
 0x20a   :  { %v425_v20 = vadd.f32 %v765_v17, %v424_v19  ;;  %v880_v21 = vpop.f32.mrb[2].mxu1 }
 0x20b   :  { %v427_v22 = vpop.f32.mrb[3].mxu1 }
 0x20c   :  { %v428_v23 = vadd.f32 %v765_v17, %v427_v22  ;;  %v487_v25 = vmul.f32 %v425_v20, %v425_v20 }
 0x20e   :  { %503 = vadd.xlane.f32.xlu0 %v487_v25  ;;  %v488_v26 = vmul.f32 %v428_v23, %v428_v23 }
 0x210   :  { %v883_v24 = vpop.f32.mrb[4].mxu1 }
 0x211   :  { %v440_v27 = vpop.f32.mrb[5].mxu1 }
 0x212   :  { %505 = vadd.xlane.f32.xlu0 %v488_v26  ;;  %v884_v28 = vpop.f32.mrb[6].mxu1 }
 0x213   :  { %v443_v29 = vpop.f32.mrb[7].mxu1 }
 0x218   :  { %v887_v30 = vpop.f32.mrb[8].mxu1 }
 0x219   :  { %v456_v31 = vpop.f32.mrb[9].mxu1 }
 0x21a   :  { %v888_v32 = vpop.f32.mrb[10].mxu1 }
 0x21b   :  { %v459_v33 = vpop.f32.mrb[11].mxu1 }
 0x220   :  { %v891_v34 = vpop.f32.mrb[12].mxu1 }
 0x221   :  { %v472_v35 = vpop.f32.mrb[13].mxu1 }
 0x222   :  { %v892_v36 = vpop.f32.mrb[14].mxu1 }
 0x223   :  { %v475_v37 = vpop.f32.mrb[15].mxu1 }
 0x29b   :  { %v504_v41 = vpop.xlane.xlu0 %503 }
 0x29c   :  { %v535_v42 = vmax.f32 %v504_v41, 1e-24 }
 0x29e   :  { %924 = vrsqrt.f32 %v535_v42 }
 0x29f   :  { %v506_v43 = vpop.xlane.xlu0 %505 }
 0x2a0   :  { %v536_v44 = vmax.f32 %v506_v43, 1e-24 }
 0x2a2   :  { %926 = vrsqrt.f32 %v536_v44 }
 0x2a8   :  { %v925_v45 = vpop.eup %924 }
 0x2a9   :  { %v567_v47 = vmul.f32 %v925_v45, %v425_v20 }
 0x2ac   :  { %v927_v46 = vpop.eup %926 }
 0x2ad   :  { %v568_v48 = vmul.f32 %v927_v46, %v428_v23 }
 0x2af   :  { %v795_v49 = vpack.c.bf16 %v568_v48, %v567_v47 }
 0x2b1   :  { %796 = vst [vmem:[#allocation8] sm:$0xff] %v795_v49  }
 0x2b2   :  { %1005 = shalt.err (!%p1002_p0)
}
 0x2b3   :  { %s1006_s12 = scalar_lea.hbm %s1137_s5, 1024 }
 0x2b4   :  { %p1007_p1 = scmp.ne.s32.totalorder %s1137_s5, %s1006_s12  ;;  %p1010_p2 = scmp.lt.u32.totalorder %s1006_s12, %s1137_s5 }
 0x2b6   :  { %p1012_p3 = pnand %p1010_p2, %p1007_p1 }
 0x2b8   :  { %1015 = shalt.err (!%p1012_p3)
}
 0x2b9   :  { %741 = dma.vmem_to_hbm [thread:$0]  %s736_s8, 1024, %s1137_s5, [#allocation4], %s1024_s30, %s1024_s30, %s1025_s6  }
 0x2ba   :  { %1020 = dma.done.wait [#allocation4], 1024  }
 0x2bb   :  { %1021 = vsyncadd [#allocation4], 4294966272 }
 0x2bc   :  { %745 = vsyncpa [#allocation3], 1 }
 0x2bd   :  { %746 = vsyncpa [#allocation6], 1 }
 0x2be   :  { %747 = vsyncpa [#allocation4], 1 }

</bundles_post_ra>
